<compile_context>
chip_gen: v7x
topology: tpu7x:2x2x1
jax: 0.10.0
libtpu: 0.0.40
codegen_flags: <defaults>
</compile_context>

<pallas_src>
import jax
import jax.numpy as jnp
from jax.experimental import pallas as pl
from jax.experimental.pallas import tpu as pltpu


def attention_kernel(comb_ref, enc_ref, w2_ref, wv_ref, out_ref):
    # comb_ref: (TB, H)     f32   -- precomputed hidden @ W1 + bias (hoisted to wrapper)
    # enc_ref:  (TB*S, 2H)  f32   -- flattened encoder_outputs rows for this batch block
    # w2_ref:   (2H, H)     bf16  -- encoder half of the concat Linear weight
    # wv_ref:   (1, H)      f32   -- v-projection row
    # out_ref:  (TB, S)     f32   -- softmax attention weights (lane-dense, S on lanes)
    TB, S = out_ref.shape
    H = w2_ref.shape[1]

    # In-VMEM bf16 cast (VPU, hidden under the DMA) then one big MXU pass with f32 accum.
    enc_bf = enc_ref[...].astype(jnp.bfloat16)                       # (TB*S, 2H)
    e_proj = jnp.dot(enc_bf, w2_ref[...],
                     preferred_element_type=jnp.float32)             # (TB*S, H) f32

    # energy = tanh(hidden@W1 + enc@W2 + b); hidden/bias term broadcasts over S.
    energy = jnp.tanh(e_proj.reshape(TB, S, H) + comb_ref[...][:, None, :])   # (TB, S, H)

    # v-projection: VPU multiply + cross-lane reduce over H -> lane-dense (TB, S) scores.
    scores = jnp.sum(energy * wv_ref[...], axis=-1)                  # (TB, S) f32

    # Softmax over the sequence axis (lanes), independently per batch row.
    m = jnp.max(scores, axis=-1, keepdims=True)                      # (TB, 1)
    e = jnp.exp(scores - m)
    inv = pl.reciprocal(jnp.sum(e, axis=-1, keepdims=True), approx=True)      # EUP
    out_ref[...] = e * inv


def _choose_block_tb(B, S, H, E, budget_bytes=12 << 20):
    """Pick a batch block height TB (divisor of B) from a VMEM byte budget.

    Only sublane-friendly heights are considered (TB % 8 == 0, or TB == B so every block
    equals the full array dim), keeping all BlockSpecs (8,128)-clean.  When several heights
    fit the budget we prefer ones giving >= 2 grid steps so v7x can use both TensorCores.
    Returns (TB, vmem_limit_bytes_or_None).
    """
    def vmem_bytes(tb):
        enc = tb * S * E * 4              # f32 enc block
        comb = tb * H * 4
        out = tb * S * 4
        weights = E * H * 2 + H * 4
        interm = 2 * tb * S * H * 4       # e_proj + energy f32 intermediates (worst case)
        return 2 * (enc + comb + out + weights) + interm   # x2 for double buffering

    divisors = [d for d in range(1, B + 1) if B % d == 0]
    legal = [d for d in divisors if d == B or (d % 8 == 0 and (d * S) % 8 == 0)]
    fitting = [d for d in legal if vmem_bytes(d) <= budget_bytes]
    multi = [d for d in fitting if B // d >= 2]
    if multi:
        tb = max(multi)
    elif fitting:
        tb = max(fitting)
    else:
        tb = min(legal)                    # smallest legal block; bump the scoped-VMEM limit
    need = vmem_bytes(tb)
    vmem_limit = None
    if need > (12 << 20):
        vmem_limit = min(need + (4 << 20), 56 << 20)
    return tb, vmem_limit


def attention_forward(hidden, encoder_outputs, w_attn, b_attn, w_v):
    """hidden: (B,H) f32, encoder_outputs: (B,S,2H) f32.
    w_attn: (H, 3H) [PyTorch Linear weight (out,in)], b_attn: (H,), w_v: (1, H)."""
    B, S, E = encoder_outputs.shape
    H = hidden.shape[1]
    assert E == 2 * H and w_attn.shape == (H, 3 * H)

    # Split the concat-Linear algebraically: cat([h, enc]) @ W.T == h @ W1 + enc @ W2.
    w_t = w_attn.T                         # (3H, H)
    w1 = w_t[:H, :]                        # (H, H)  acts on hidden
    w2 = w_t[H:, :].astype(jnp.bfloat16)   # (2H, H) acts on encoder_outputs (tiny weight cast)
    wv = w_v.astype(jnp.float32)           # (1, H)

    # Hoisted hidden projection: one (B,H)@(H,H) f32 matmul + bias, done once for all blocks.
    comb = (jnp.dot(hidden, w1) + b_attn).astype(jnp.float32)        # (B, H)

    # Free row-major metadata reshape in HBM; kernel sees clean 2-D (TB*S, 2H) blocks.
    enc_flat = encoder_outputs.reshape(B * S, E)

    TB, vmem_limit = _choose_block_tb(B, S, H, E)
    grid = (B // TB,)

    cost = pl.CostEstimate(
        flops=2 * B * S * E * H + 2 * B * S * H + 5 * B * S,
        transcendentals=B * S * H + B * S + B,
        bytes_accessed=B * S * E * 4 + B * H * 4 + B * S * 4 + E * H * 2 + H * 4,
    )

    out = pl.pallas_call(
        attention_kernel,
        out_shape=jax.ShapeDtypeStruct((B, S), jnp.float32),
        grid_spec=pltpu.PrefetchScalarGridSpec(
            num_scalar_prefetch=0,
            grid=grid,
            in_specs=[
                pl.BlockSpec((TB, H), lambda i: (i, 0)),         # hidden@W1 + b
                pl.BlockSpec((TB * S, E), lambda i: (i, 0)),     # encoder_outputs (f32)
                pl.BlockSpec((E, H), lambda i: (0, 0)),          # W2 (bf16)
                pl.BlockSpec((1, H), lambda i: (0, 0)),          # v weight row
            ],
            out_specs=pl.BlockSpec((TB, S), lambda i: (i, 0)),   # lane-dense softmax output
        ),
        compiler_params=pltpu.CompilerParams(
            dimension_semantics=("parallel",),   # independent batch blocks (v7x: 2 TCs)
            vmem_limit_bytes=vmem_limit,
        ),
        cost_estimate=cost,
    )(comb, enc_flat, w2, wv)
    return out


def attention_reference(hidden, encoder_outputs, w_attn, b_attn, w_v):
    B, S, _ = encoder_outputs.shape
    h_rep = jnp.repeat(hidden[:, None, :], S, axis=1)
    x = jnp.concatenate([h_rep, encoder_outputs], axis=2)                  # (B, S, 3H)
    energy = jnp.tanh(jnp.einsum("bsk,hk->bsh", x, w_attn) + b_attn)
    scores = jnp.einsum("bsh,oh->bso", energy, w_v)[..., 0]                # (B, S)
    return jax.nn.softmax(scores, axis=1)


if __name__ == "__main__":
    B, S, H = 2, 8, 32  # batch, seq, hidden_dim

    key = jax.random.PRNGKey(0)
    k1, k2, k3, k4, k5 = jax.random.split(key, 5)

    hidden = jax.random.normal(k1, (B, H), dtype=jnp.float32)
    encoder_outputs = jax.random.normal(k2, (B, S, 2 * H), dtype=jnp.float32)

    # Deterministic parameter init (PyTorch Linear-style uniform bounds).
    bound_attn = 1.0 / (3.0 * H) ** 0.5
    w_attn = jax.random.uniform(k3, (H, 3 * H), jnp.float32, -bound_attn, bound_attn)
    b_attn = jax.random.uniform(k4, (H,), jnp.float32, -bound_attn, bound_attn)
    bound_v = 1.0 / H ** 0.5
    w_v = jax.random.uniform(k5, (1, H), jnp.float32, -bound_v, bound_v)

    out = attention_forward(hidden, encoder_outputs, w_attn, b_attn, w_v)
    out = jax.block_until_ready(out)

    ref = attention_reference(hidden, encoder_outputs, w_attn, b_attn, w_v)
    assert out.shape == (B, S)
    # bf16 MXU inputs + approx reciprocal loosen the tolerance vs the pure-f32 reference.
    assert jnp.allclose(out, ref, atol=2e-2, rtol=2e-2), "mismatch vs JAX reference"
    assert jnp.allclose(jnp.sum(out, axis=1), 1.0, atol=5e-3)

    print("KERNEL_OK")
</pallas_src>

<mosaic_0001>
module attributes {stable_mosaic.version = 11 : i64} {
  func.func @attention_kernel(%arg0: i32, %arg1: memref<2x32xf32, #tpu.memory_space<vmem>>, %arg2: memref<16x64xf32, #tpu.memory_space<vmem>>, %arg3: memref<64x32xbf16, #tpu.memory_space<vmem>>, %arg4: memref<1x32xf32, #tpu.memory_space<vmem>>, %arg5: memref<2x8xf32, #tpu.memory_space<vmem>>) attributes {dimension_semantics = [#tpu.dimension_semantics<parallel>], iteration_bounds = array<i64: 1>, scalar_prefetch = 0 : i64, scratch_operands = 0 : i64, tpu.core_type = #tpu.core_type<tc>, window_params = [{transform_indices = @transform_0, window_bounds = array<i64: 2, 32>}, {transform_indices = @transform_1, window_bounds = array<i64: 16, 64>}, {pipeline_mode = #tpu.pipeline_mode<synchronous>, transform_indices = @transform_2, window_bounds = array<i64: 64, 32>}, {pipeline_mode = #tpu.pipeline_mode<synchronous>, transform_indices = @transform_3, window_bounds = array<i64: 1, 32>}, {transform_indices = @transform_4, window_bounds = array<i64: 2, 8>}]} {
    %c0 = arith.constant 0 : index
    %c0_0 = arith.constant 0 : index
    %0 = vector.load %arg2[%c0, %c0_0] : memref<16x64xf32, #tpu.memory_space<vmem>>, vector<16x64xf32>
    %1 = arith.truncf %0 : vector<16x64xf32> to vector<16x64xbf16>
    %c0_1 = arith.constant 0 : index
    %c0_2 = arith.constant 0 : index
    %2 = vector.load %arg3[%c0_1, %c0_2] : memref<64x32xbf16, #tpu.memory_space<vmem>>, vector<64x32xbf16>
    %cst = arith.constant dense<0.000000e+00> : vector<16x32xf32>
    %3 = tpu.matmul %1, %2, %cst {dimension_numbers = #tpu.dot_dimension_numbers<[1], [0], [0], [1], [0, 0, 1, 1], [], []>} : vector<16x64xbf16>, vector<64x32xbf16>, vector<16x32xf32> -> vector<16x32xf32>
    %4 = vector.shape_cast %3 : vector<16x32xf32> to vector<2x8x32xf32>
    %c0_3 = arith.constant 0 : index
    %c0_4 = arith.constant 0 : index
    %5 = vector.load %arg1[%c0_3, %c0_4] : memref<2x32xf32, #tpu.memory_space<vmem>>, vector<2x32xf32>
    %6 = vector.shape_cast %5 : vector<2x32xf32> to vector<2x1x32xf32>
    %7 = vector.broadcast %6 : vector<2x1x32xf32> to vector<2x8x32xf32>
    %8 = arith.addf %4, %7 : vector<2x8x32xf32>
    %9 = math.tanh %8 : vector<2x8x32xf32>
    %c0_5 = arith.constant 0 : index
    %c0_6 = arith.constant 0 : index
    %10 = vector.load %arg4[%c0_5, %c0_6] : memref<1x32xf32, #tpu.memory_space<vmem>>, vector<1x32xf32>
    %11 = vector.shape_cast %10 : vector<1x32xf32> to vector<1x1x32xf32>
    %12 = vector.broadcast %11 : vector<1x1x32xf32> to vector<2x8x32xf32>
    %13 = arith.mulf %9, %12 : vector<2x8x32xf32>
    %cst_7 = arith.constant dense<0.000000e+00> : vector<2x8xf32>
    %14 = vector.multi_reduction <add>, %13, %cst_7 [2] : vector<2x8x32xf32> to vector<2x8xf32>
    %cst_8 = arith.constant dense<0xFF800000> : vector<2xf32>
    %15 = vector.multi_reduction <maximumf>, %14, %cst_8 [1] : vector<2x8xf32> to vector<2xf32>
    %16 = vector.shape_cast %15 : vector<2xf32> to vector<2x1xf32>
    %17 = vector.broadcast %16 : vector<2x1xf32> to vector<2x8xf32>
    %18 = arith.subf %14, %17 : vector<2x8xf32>
    %19 = math.exp %18 : vector<2x8xf32>
    %cst_9 = arith.constant dense<0.000000e+00> : vector<2xf32>
    %20 = vector.multi_reduction <add>, %19, %cst_9 [1] : vector<2x8xf32> to vector<2xf32>
    %21 = vector.shape_cast %20 : vector<2xf32> to vector<2x1xf32>
    %22 = tpu.reciprocal %21 {approx = true} : vector<2x1xf32> -> vector<2x1xf32>
    %23 = vector.broadcast %22 : vector<2x1xf32> to vector<2x8xf32>
    %24 = arith.mulf %19, %23 : vector<2x8xf32>
    %c0_10 = arith.constant 0 : index
    %c0_11 = arith.constant 0 : index
    %25 = vector.load %arg5[%c0_10, %c0_11] : memref<2x8xf32, #tpu.memory_space<vmem>>, vector<2x8xf32>
    tpu.vector_store %arg5[%c0_10, %c0_11], %24 {strides = array<i32>} : memref<2x8xf32, #tpu.memory_space<vmem>>, vector<2x8xf32>,
    return
  }
  func.func @transform_0(%arg0: i32) -> (i32, i32) {
    %c0_i32 = arith.constant 0 : i32
    %c0_i32_0 = arith.constant 0 : i32
    return %arg0, %c0_i32 : i32, i32
  }
  func.func @transform_1(%arg0: i32) -> (i32, i32) {
    %c0_i32 = arith.constant 0 : i32
    %c0_i32_0 = arith.constant 0 : i32
    return %arg0, %c0_i32 : i32, i32
  }
  func.func @transform_2(%arg0: i32) -> (i32, i32) {
    %c0_i32 = arith.constant 0 : i32
    %c0_i32_0 = arith.constant 0 : i32
    %c0_i32_1 = arith.constant 0 : i32
    return %c0_i32, %c0_i32_0 : i32, i32
  }
  func.func @transform_3(%arg0: i32) -> (i32, i32) {
    %c0_i32 = arith.constant 0 : i32
    %c0_i32_0 = arith.constant 0 : i32
    %c0_i32_1 = arith.constant 0 : i32
    return %c0_i32, %c0_i32_0 : i32, i32
  }
  func.func @transform_4(%arg0: i32) -> (i32, i32) {
    %c0_i32 = arith.constant 0 : i32
    %c0_i32_0 = arith.constant 0 : i32
    return %arg0, %c0_i32 : i32, i32
  }
}

</mosaic_0001>

<bundles_post_ra>
// kernel: tpu_custom_call.1
= control target key start
LH: loop header
LB: loop body
LE: loop exit
PB: predicated region body
PF: predicated region fallthrough
CT: control target
= control target key end

     0   :  { %v326_v1 = vmov 0.0   ;;  %vm327_vm0 = vmmov 0   ;;  %s404_s0 = inlined_call_operand.vmem [shape: f32[2,32], index: 0, kind: input, shape index: {}]   ;;  %s405_s1 = inlined_call_operand.vmem [shape: f32[16,64], index: 1, kind: input, shape index: {}]   ;;  %s406_s2 = inlined_call_operand.vmem [shape: bf16[64,32], index: 2, kind: input, shape index: {}]   ;;  %s407_s3 = inlined_call_operand.vmem [shape: f32[1,32], index: 3, kind: input, shape index: {}]   ;;  %s408_s4 = inlined_call_operand.hbm [shape: f32[2,8], index: 4, kind: output, shape index: {}]  }
   0x1   :  { %v288_v0 = vld [vmem:[%s406_s2] sm:$0xff]   ;;  %269 = vmatprep.subr.bf16.mxu0 %v326_v1  ;;  %v289_v2 = vld [vmem:[%s406_s2 + $0x8] sm:$0xff]   ;;  %277 = vmatprep.mubr.msk.bf16.mxu0 %vm327_vm0, %v326_v1 }
   0x2   :  { %270 = vmatpush3.bf16.msra.mxu0 %v288_v0 }
   0x3   :  { %271 = vmatprep.subr.bf16.mxu0 %v326_v1 }
   0x4   :  { %9 = vsyncpa [#allocation3], 0  ;;  %v290_v3 = vld [vmem:[%s406_s2 + $0x10] sm:$0xff]   ;;  %v291_v4 = vld [vmem:[%s406_s2 + $0x18] sm:$0xff]   ;;  %vm54_vm1 = vcmask 523264   ;;  %v112_v10 = vlaneseq  ;;  %vm146_vm2 = vcmask 261120  }
   0x5   :  { %v19_v5 = vld [vmem:[%s405_s1] sm:$0xff]  ;;  %v20_v6 = vld [vmem:[%s405_s1 + $0x8] sm:$0xff]  ;;  %v328_v8 = vmov 1966171168   ;;  %vm165_vm3 = vcmask 1041409   ;;  %vm168_vm4 = vcmask 58368  }
   0x6   :  { %272 = vmatpush3.bf16.msra.mxu0 %v289_v2  ;;  %v21_v7 = vpack.c.bf16 %v20_v6, %v19_v5  ;;  %v110_v9 = vunpack.c.l.s4 %v328_v8  ;;  %v374_v12 = vshrl.u32 %v112_v10, 7  ;;  %v262_v13 = vld.sshfl [vmem:[%s404_s0] sm:$0x11 pattern:$0x75316420]  ;;  %v156_v34 = vand.u32 127, %v112_v10 }
   0x7   :  { %273 = vmatprep.subr.bf16.mxu0 %v326_v1  ;;  %v108_v15 = vcombine.high %v262_v13, %v262_v13  ;;  %v263_v27 = vld [vmem:[%s407_s3] ss:$0 sm:$0xff]  ;;  %v329_v42 = vmov 0   ;;  %s330_s0 = smov [#allocation2]  }
   0x8   :  { %v111_v11 = vunpack.c.0.s8 %v110_v9  ;;  %v125_v17 = vsub.s32 0, %v374_v12  ;;  %v159_v36 = vsub.s32 %v156_v34, %v374_v12  ;;  %287 = vset.pattern.permute.xlu0 %v329_v42  ;;  %286 = vset.pattern.permute.xlu1 %v329_v42  ;;  %v179_v43 = vsub.s32 1, %v374_v12  ;;  %s249_s3 = sshll.u32 %s330_s0, 4  ;;  %s250_s3 = int_to_ptr.vmem [resolvable:$true] %s249_s3 }
   0x9   :  { %s302_s29 = scalar_lea.vmem %s250_s3, 32  ;;  %p307_p1 = scmp.lt.s32.totalorder %s250_s3, %s250_s3 }
   0xa   :  { %274 = vmatpush3.bf16.msra.mxu0 %v290_v3  ;;  %v114_v14 = vsub.s32 %v111_v11, %v374_v12  ;;  %p303_p0 = scmp.ne.s32.totalorder %s250_s3, %s302_s29  ;;  %p308_p2 = scmp.lt.s32.totalorder %s302_s29, %s302_s29 }
   0xb   :  { %275 = vmatprep.subr.bf16.mxu0 %v326_v1 }
   0xc   :  { %v115_v16 = vrot.slane %v262_v13, %v114_v14  ;;  %v122_v18 = vrot.slane %v108_v15, %v114_v14  ;;  %p309_p3 = por %p308_p2, %p307_p1 }
   0xe   :  { %276 = vmatpush3.bf16.msra.mxu0 %v291_v4  ;;  %v126_v19 = vrot.slane %v115_v16, %v125_v17  ;;  %v130_v20 = vrot.slane %v122_v18, %v125_v17  ;;  %p310_p4 = pnand %p309_p3, %p303_p0 }
  0x11   :  { %278 = vmatmul.mubr.msk.bf16.vlgmr.msra.gmra.mrb[0].mxu0 %vm54_vm1, %v21_v7 }
  0xe4   :  { %v92_v21 = vpop.f32.mrb[0].mxu0 }
  0xe5   :  { %v133_v22 = vadd.f32 %v126_v19, %v92_v21  ;;  %v279_v23 = vpop.f32.mrb[1].mxu0 }
  0xe6   :  { %v95_v24 = vpop.f32.mrb[2].mxu0 }
  0xe7   :  { %292 = vtanh.f32 %v133_v22  ;;  %v134_v25 = vadd.f32 %v130_v20, %v95_v24  ;;  %v280_v26 = vpop.f32.mrb[3].mxu0 }
  0xe9   :  { %294 = vtanh.f32 %v134_v25 }
  0xf1   :  { %v293_v28 = vpop.eup %292 }
  0xf2   :  { %v144_v29 = vmul.f32 %v293_v28, %v263_v27 }
  0xf3   :  { %v295_v30 = vpop.eup %294 }
  0xf4   :  { %v147_v31 = vsel %vm146_vm2, %v144_v29, 0.0  ;;  %v145_v32 = vmul.f32 %v295_v30, %v263_v27 }
  0xf5   :  { %148 = vadd.xlane.f32.xlu0 %v147_v31 }
  0xf6   :  { %v150_v33 = vsel %vm146_vm2, %v145_v32, 0.0 }
  0xf9   :  { %151 = vadd.xlane.f32.xlu0 %v150_v33 }
 0x182   :  { %v149_v35 = vpop.xlane.xlu0 %148 }
 0x183   :  { %v160_v38 = vrot.slane %v149_v35, %v159_v36 }
 0x186   :  { %v152_v37 = vpop.xlane.xlu0 %151 }
 0x187   :  { %v164_v39 = vrot.slane %v152_v37, %v159_v36 }
 0x189   :  { %v166_v40 = vsel %vm165_vm3, %v164_v39, %v160_v38 }
 0x18a   :  { %v169_v41 = vsel %vm168_vm4, %v166_v40, -inf }
 0x18b   :  { %170 = vmax.xlane.f32.xlu1 %v169_v41 }
 0x218   :  { %v171_v44 = vpop.xlane.xlu1 %170 }
 0x219   :  { %v176_v45 = vrot.slane %v171_v44, %v125_v17  ;;  %v180_v46 = vrot.slane %v171_v44, %v179_v43 }
 0x21b   :  { %v183_v47 = vsub.f32 %v149_v35, %v176_v45  ;;  %v184_v48 = vsub.f32 %v152_v37, %v180_v46 }
 0x21d   :  { %v185_v49 = vmul.f32 1.442695, %v183_v47  ;;  %v187_v50 = vmul.f32 1.442695, %v184_v48 }
 0x21f   :  { %296 = vpow2.f32 %v185_v49 }
 0x220   :  { %298 = vpow2.f32 %v187_v50 }
 0x229   :  { %v297_v51 = vpop.eup %296 }
 0x22a   :  { %v299_v52 = vpop.eup %298  ;;  %192 = vperm.xlu1 %286, %v297_v51  }
 0x22b   :  { %195 = vperm.xlu0 %287, %v299_v52  }
 0x2a9   :  { %v193_v53 = vpop.permute.xlu1 %192 }
 0x2aa   :  { %v196_v54 = vpop.permute.xlu0 %195  ;;  %v200_v55 = vrot.slane %v193_v53, %v159_v36 }
 0x2ab   :  { %v204_v56 = vrot.slane %v196_v54, %v159_v36 }
 0x2ad   :  { %v205_v57 = vsel %vm165_vm3, %v204_v56, %v200_v55 }
 0x2ae   :  { %v207_v58 = vsel %vm168_vm4, %v205_v57, 0.0 }
 0x2af   :  { %208 = vadd.xlane.f32.xlu1 %v207_v58 }
 0x33c   :  { %v209_v59 = vpop.xlane.xlu1 %208 }
 0x33d   :  { %300 = vrcp.f32 %v209_v59 }
 0x347   :  { %v301_v60 = vpop.eup %300 }
 0x348   :  { %v215_v61 = vrot.slane %v301_v60, %v125_v17  ;;  %v219_v63 = vrot.slane %v301_v60, %v179_v43 }
 0x34a   :  { %v222_v62 = vmul.f32 %v297_v51, %v215_v61  ;;  %v223_v0 = vmul.f32 %v299_v52, %v219_v63 }
 0x34c   :  { %227 = vperm.xlu0 %287, %v222_v62  }
 0x350   :  { %230 = vperm.xlu0 %287, %v223_v0  }
 0x3cb   :  { %v228_v1 = vpop.permute.xlu0 %227 }
 0x3cc   :  { %v235_v3 = vrot.slane %v228_v1, %v159_v36 }
 0x3cf   :  { %v231_v2 = vpop.permute.xlu0 %230 }
 0x3d0   :  { %v239_v4 = vrot.slane %v231_v2, %v159_v36 }
 0x3d2   :  { %v240_v5 = vsel %vm165_vm3, %v239_v4, %v235_v3 }
 0x3d3   :  { %242 = vst.msk [vmem:[#allocation2] sm:$0x3] %vm168_vm4, %v240_v5 }
 0x3d4   :  { %313 = shalt.err (!%p310_p4)
}
 0x3d5   :  { %s314_s6 = scalar_lea.hbm %s408_s4, 32 }
 0x3d6   :  { %p315_p5 = scmp.ne.s32.totalorder %s408_s4, %s314_s6  ;;  %p318_p6 = scmp.lt.u32.totalorder %s314_s6, %s408_s4 }
 0x3d8   :  { %p320_p7 = pnand %p318_p6, %p315_p5 }
 0x3da   :  { %323 = shalt.err (!%p320_p7)
}
 0x3db   :  { %252 = dma.vmem_to_hbm [thread:$0]  %s250_s3, 32, %s408_s4, [#allocation3]  }
 0x3dc   :  { %324 = dma.done.wait [#allocation3], 32  }
 0x3dd   :  { %325 = vsyncadd [#allocation3], 4294967264 }
 0x3de   :  { %256 = vsyncpa [#allocation3], 1 }

</bundles_post_ra>
